<compile_context>
chip_gen: v7x
topology: tpu7x:2x2x1
jax: 0.10.0
libtpu: 0.0.40
codegen_flags: <defaults>
</compile_context>

<pallas_src>
import functools

import numpy as np
import jax
import jax.numpy as jnp
from jax import lax
from jax.experimental import pallas as pl
from jax.experimental.pallas import tpu as pltpu

LANE = 128      # TPU lane width  (last dim of every VMEM tile)
SUBLANE = 8     # TPU sublane granularity (second-to-last dim)


def _round_up(x, m):
    return ((x + m - 1) // m) * m


def _pad2(x, rows, cols):
    """Zero-pad a 2D array up to (rows, cols)."""
    return jnp.pad(x, ((0, rows - x.shape[0]), (0, cols - x.shape[1])))


def _leaky(x, slope=0.2):
    return jnp.where(x > 0, x, slope * x)


# ---------------- kernel 1: product encoder (batch independent, one shot) ----

def prod_encoder_kernel(res_ref, prod_ref, w_ref, b_ref, out_ref):
    """(P_pad, F_pad) -> transposed (E_pad, P_pad), pre-scaled by res_w[0].

    (Linear + folded eval-BN + LeakyReLU) x 2, then one-shot transpose so the
    per-batch-step util matmul is a canonical (M,K)@(K,N).
    """
    f32 = jnp.float32
    x = prod_ref[...]
    x = _leaky(jnp.dot(x, w_ref[0], preferred_element_type=f32) + b_ref[0])
    x = _leaky(jnp.dot(x, w_ref[1], preferred_element_type=f32) + b_ref[1])
    # Fold the Res-head utility weight into the resident product features so the
    # main kernel never multiplies util by res_w[0] per grid step.
    out_ref[...] = x.T * res_ref[0]


# ---------------- kernel 2: batched forward pass ------------------------------

def res_assort_kernel(res_ref,       # SMEM (3,): [w_util (unused here), w_assort, bias]
                      xin_ref,       # VMEM (block_b, PAD): [assorts | cusF | 0-pad]
                      prod_t_ref,    # VMEM (PAD, PAD): prod_feat.T * w_util, resident
                      w_ref, b_ref,  # VMEM (4, PAD, PAD) / (4, 1, PAD), resident
                      out_ref,       # VMEM (block_b, PAD)
                      *, product_num):
    f32 = jnp.float32

    x = xin_ref[...]                                          # packed input tile
    lane = lax.broadcasted_iota(jnp.int32, x.shape, 1)
    pmask = lane < product_num                                # real product lanes
    a = jnp.where(pmask, x, 0.0)                              # assortment mask (0/1)

    # ---- customer encoder: packed input feeds W[0] directly (P zero rows
    #      were prepended to the first customer weight in the wrapper) ----
    h = _leaky(jnp.dot(x, w_ref[0], preferred_element_type=f32) + b_ref[0])
    h = _leaky(jnp.dot(h, w_ref[1], preferred_element_type=f32) + b_ref[1])

    # ---- encoded utilities: canonical (M,K)@(K,N) against resident prod_t ----
    # prod_t is already scaled by res_w[0].
    util = jnp.dot(h, prod_t_ref[...], preferred_element_type=f32)

    # ---- Res head: Linear(2,1) over [util, assort] channels, then sigmoid ----
    z = util + a * res_ref[1] + res_ref[2]
    e = pl.reciprocal(1.0 + jnp.exp(-z), approx=True)         # sigmoid (EUP recip)

    # ---- cross-effect MLP: (block_b, P_pad) -> hidden -> (block_b, P_pad) ----
    # Zero weight rows for padded product columns kill any padding garbage in e.
    p = _leaky(jnp.dot(e, w_ref[2], preferred_element_type=f32) + b_ref[2])
    p = _leaky(jnp.dot(p, w_ref[3], preferred_element_type=f32) + b_ref[3])

    # ---- softmax * assortment mask / renormalize ----
    # softmax(p)*a / sum(softmax(p)*a) == exp(p-m)*a / sum(exp(p-m)*a): the
    # softmax denominator cancels, so one EUP reciprocal suffices.  Padded
    # product lanes are masked to -inf so the row max only covers real logits.
    p = jnp.where(pmask, p, -jnp.inf)
    m = jnp.max(p, axis=-1, keepdims=True)
    masked = jnp.exp(p - m) * a
    denom = jnp.sum(masked, axis=-1, keepdims=True)
    out_ref[...] = masked * pl.reciprocal(denom, approx=True)


# ------------------------------- host wrapper ---------------------------------

def res_assort_forward(inp, products, params, product_num, *, block_b=512):
    """inp: (B, product_num + customer_feature_length) float32."""
    f32 = jnp.float32
    B = inp.shape[0]
    P = product_num
    C = inp.shape[1] - P

    (cw1, cb1), (cw2, cb2) = params["cus"]
    (pw1, pb1), (pw2, pb2) = params["prod"]
    (xw1, xb1), (xw2, xb2) = params["cross"]
    res_w, res_b = params["res"]

    # one lane-dense width for every feature axis (all real dims are <= 128
    # here, so a single PAD = 128 is already the per-axis minimum)
    dims = [P + C, products.shape[1],
            cw1.shape[1], cw2.shape[1], pw1.shape[1], pw2.shape[1],
            xw1.shape[1], xw2.shape[1]]
    PAD = _round_up(max(dims), LANE)

    vmem = pl.BlockSpec(memory_space=pltpu.MemorySpace.VMEM)
    smem = pl.BlockSpec(memory_space=pltpu.MemorySpace.SMEM)

    # Res-head scalars: [w_util, w_assort, bias]
    res = jnp.concatenate([jnp.asarray(res_w).reshape(-1),
                           jnp.asarray(res_b).reshape(-1)]).astype(f32)   # (3,)

    # --- batch-independent product encoder: one tiny grid-less call ----------
    prod_p = _pad2(products.astype(f32), PAD, PAD)
    pw = jnp.stack([_pad2(pw1, PAD, PAD), _pad2(pw2, PAD, PAD)])
    pb = jnp.stack([_pad2(pb1, 1, PAD), _pad2(pb2, 1, PAD)])
    prod_feat_t = pl.pallas_call(
        prod_encoder_kernel,
        out_shape=jax.ShapeDtypeStruct((PAD, PAD), f32),
        in_specs=[smem, vmem, vmem, vmem],
        out_specs=vmem,
    )(res, prod_p, pw, pb)

    # --- batch tiling ----------------------------------------------------------
    # Big default tile (step-overhead bound kernel), but cap so there are at
    # least 2 grid blocks whenever the batch allows -> both v7x TensorCores.
    block_b = _round_up(max(block_b, SUBLANE), SUBLANE)
    block_b = max(SUBLANE, min(block_b, _round_up(pl.cdiv(B, 2), SUBLANE)))
    B_pad = _round_up(B, block_b)
    n_blocks = B_pad // block_b

    # single packed streamed input: [assorts | cusF | 0-pad]
    xin = _pad2(inp.astype(f32), B_pad, PAD)
    if B_pad > B:
        # padded batch rows: offer the no_purchase option so denom > 0 (no NaN)
        xin = xin.at[B:, 0].set(1.0)

    # customer-encoder first layer consumes the packed input directly:
    # prepend P zero rows so assortment lanes contribute nothing.
    cw1_ext = jnp.concatenate(
        [jnp.zeros((P, cw1.shape[1]), f32), cw1.astype(f32)], axis=0)
    W = jnp.stack([_pad2(cw1_ext, PAD, PAD), _pad2(cw2, PAD, PAD),
                   _pad2(xw1, PAD, PAD), _pad2(xw2, PAD, PAD)])
    Bias = jnp.stack([_pad2(cb1, 1, PAD), _pad2(cb2, 1, PAD),
                      _pad2(xb1, 1, PAD), _pad2(xb2, 1, PAD)])

    out_p = pl.pallas_call(
        functools.partial(res_assort_kernel, product_num=P),
        out_shape=jax.ShapeDtypeStruct((B_pad, PAD), f32),
        grid_spec=pltpu.PrefetchScalarGridSpec(
            num_scalar_prefetch=0,
            grid=(n_blocks,),
            in_specs=[
                smem,                                              # res scalars
                pl.BlockSpec((block_b, PAD), lambda i: (i, 0)),    # packed input
                pl.BlockSpec((PAD, PAD), lambda i: (0, 0)),        # prod_feat.T (resident)
                pl.BlockSpec((4, PAD, PAD), lambda i: (0, 0, 0)),  # stacked weights (resident)
                pl.BlockSpec((4, 1, PAD), lambda i: (0, 0, 0)),    # stacked biases (resident)
            ],
            out_specs=pl.BlockSpec((block_b, PAD), lambda i: (i, 0)),
        ),
        compiler_params=pltpu.CompilerParams(
            dimension_semantics=("parallel",)),
    )(res, xin, prod_feat_t, W, Bias)

    return out_p[:B, :P]


# ----------------------- deterministic parameter init -------------------------

def init_linear_bn_folded(key, in_dim, out_dim):
    """Linear(in,out) + BatchNorm1d(out) in eval mode, folded to one affine."""
    ks = jax.random.split(key, 6)
    W = jax.random.normal(ks[0], (in_dim, out_dim), jnp.float32) / np.sqrt(in_dim)
    b = 0.1 * jax.random.normal(ks[1], (out_dim,), jnp.float32)
    gamma = 1.0 + 0.1 * jax.random.normal(ks[2], (out_dim,), jnp.float32)
    beta = 0.1 * jax.random.normal(ks[3], (out_dim,), jnp.float32)
    mean = 0.1 * jax.random.normal(ks[4], (out_dim,), jnp.float32)
    var = jnp.abs(jax.random.normal(ks[5], (out_dim,), jnp.float32)) + 0.5
    eps = 1e-5
    s = gamma / jnp.sqrt(var + eps)
    Wf = W * s[None, :]
    bf = (b - mean) * s + beta
    return Wf.astype(jnp.float32), bf.reshape(1, -1).astype(jnp.float32)


# -------------------------------- pure-JAX ref ---------------------------------

def reference_forward(inp, products, params, product_num):
    def leaky(x):
        return jnp.where(x > 0, x, 0.2 * x)

    assorts = inp[:, :product_num]
    cusf = inp[:, product_num:]
    (cw1, cb1), (cw2, cb2) = params["cus"]
    (pw1, pb1), (pw2, pb2) = params["prod"]
    (xw1, xb1), (xw2, xb2) = params["cross"]
    res_w, res_b = params["res"]

    hi = jax.lax.Precision.HIGHEST
    prod = leaky(jnp.dot(products, pw1, precision=hi) + pb1)
    prod = leaky(jnp.dot(prod, pw2, precision=hi) + pb2)
    cus = leaky(jnp.dot(cusf, cw1, precision=hi) + cb1)
    cus = leaky(jnp.dot(cus, cw2, precision=hi) + cb2)
    util = jnp.dot(cus, prod.T, precision=hi)
    z = util * res_w[0] + assorts * res_w[1] + res_b[0]
    e = jax.nn.sigmoid(z)
    p = leaky(jnp.dot(e, xw1, precision=hi) + xb1)
    p = leaky(jnp.dot(p, xw2, precision=hi) + xb2)
    p = jax.nn.softmax(p, axis=-1)
    p = p * assorts
    return p / jnp.sum(p, axis=-1, keepdims=True)


# ----------------------------------- main ---------------------------------------

def make_inputs(key, batch, product_num, customer_feature_length):
    k_a, k_c = jax.random.split(key)
    assorts = jax.random.bernoulli(k_a, 0.6, (batch, product_num)).astype(jnp.float32)
    assorts = assorts.at[:, 0].set(1.0)     # no_purchase option always offered
    cusF = jax.random.normal(k_c, (batch, customer_feature_length), jnp.float32)
    return jnp.concatenate([assorts, cusF], axis=1)       # (B, P + C)


if __name__ == "__main__":
    # model_args (small, consistent with the module's constraints)
    product_num = 8                 # includes the no_purchase option
    product_feature_length = 8
    customer_feature_length = 16
    customer_encoder_midlayers = [32, 16]
    product_encoder_midlayers = [32, 16]    # last entry must match customer encoder
    cross_effect_layers = [32]

    key = jax.random.PRNGKey(0)
    k_prod, k_in1, k_in2, k_p1, k_p2, k_c1, k_c2, k_x1, k_x2, k_res = \
        jax.random.split(key, 10)

    # products: (product_num - 1, F), then prepend the all-zero no_purchase row
    raw_products = jax.random.normal(
        k_prod, (product_num - 1, product_feature_length), jnp.float32)
    products = jnp.concatenate(
        [jnp.zeros((1, product_feature_length), jnp.float32), raw_products], axis=0)

    # parameters (Linear + eval-mode BatchNorm folded), deterministic
    params = {
        "cus": [
            init_linear_bn_folded(k_c1, customer_feature_length, customer_encoder_midlayers[0]),
            init_linear_bn_folded(k_c2, customer_encoder_midlayers[0], customer_encoder_midlayers[1]),
        ],
        "prod": [
            init_linear_bn_folded(k_p1, product_feature_length, product_encoder_midlayers[0]),
            init_linear_bn_folded(k_p2, product_encoder_midlayers[0], product_encoder_midlayers[1]),
        ],
        "cross": [
            init_linear_bn_folded(k_x1, product_num, cross_effect_layers[0]),
            init_linear_bn_folded(k_x2, cross_effect_layers[0], product_num),
        ],
        "res": (
            0.5 * jax.random.normal(jax.random.fold_in(k_res, 0), (2,), jnp.float32),
            0.1 * jax.random.normal(jax.random.fold_in(k_res, 1), (1,), jnp.float32),
        ),
    }

    # run 1: tiny batch (default block_b; capped to a single 8-row block)
    x1 = make_inputs(k_in1, 4, product_num, customer_feature_length)
    out1 = jax.block_until_ready(res_assort_forward(x1, products, params, product_num))
    ref1 = jax.block_until_ready(reference_forward(x1, products, params, product_num))
    np.testing.assert_allclose(np.asarray(out1), np.asarray(ref1), rtol=3e-3, atol=3e-3)
    assert np.allclose(np.asarray(out1).sum(-1), 1.0, atol=5e-3)

    # run 2: batch that exercises multiple grid steps (B_pad = 24 -> 3 blocks of 8)
    x2 = make_inputs(k_in2, 20, product_num, customer_feature_length)
    out2 = jax.block_until_ready(
        res_assort_forward(x2, products, params, product_num, block_b=8))
    ref2 = jax.block_until_ready(reference_forward(x2, products, params, product_num))
    np.testing.assert_allclose(np.asarray(out2), np.asarray(ref2), rtol=3e-3, atol=3e-3)
    assert np.allclose(np.asarray(out2).sum(-1), 1.0, atol=5e-3)

    print("KERNEL_OK")
</pallas_src>

<mosaic_0001>
module attributes {stable_mosaic.version = 11 : i64} {
  func.func @prod_encoder_kernel(%arg0: memref<3xf32, #tpu.memory_space<smem>>, %arg1: memref<128x128xf32, #tpu.memory_space<vmem>>, %arg2: memref<2x128x128xf32, #tpu.memory_space<vmem>>, %arg3: memref<2x1x128xf32, #tpu.memory_space<vmem>>, %arg4: memref<128x128xf32, #tpu.memory_space<vmem>>) attributes {dimension_semantics = [], scalar_prefetch = 0 : i64, scratch_operands = 0 : i64, tpu.core_type = #tpu.core_type<tc>} {
    %c0 = arith.constant 0 : index
    %c0_0 = arith.constant 0 : index
    %0 = vector.load %arg1[%c0, %c0_0] : memref<128x128xf32, #tpu.memory_space<vmem>>, vector<128x128xf32>
    %c0_1 = arith.constant 0 : index
    %c0_2 = arith.constant 0 : index
    %c0_3 = arith.constant 0 : index
    %1 = vector.load %arg2[%c0_1, %c0_2, %c0_3] : memref<2x128x128xf32, #tpu.memory_space<vmem>>, vector<1x128x128xf32>
    %2 = vector.shape_cast %1 : vector<1x128x128xf32> to vector<128x128xf32>
    %cst = arith.constant dense<0.000000e+00> : vector<128x128xf32>
    %3 = tpu.matmul %0, %2, %cst {dimension_numbers = #tpu.dot_dimension_numbers<[1], [0], [0], [1], [0, 0, 1, 1], [], []>} : vector<128x128xf32>, vector<128x128xf32>, vector<128x128xf32> -> vector<128x128xf32>
    %c0_4 = arith.constant 0 : index
    %c0_5 = arith.constant 0 : index
    %c0_6 = arith.constant 0 : index
    %4 = vector.load %arg3[%c0_4, %c0_5, %c0_6] : memref<2x1x128xf32, #tpu.memory_space<vmem>>, vector<1x1x128xf32>
    %5 = vector.shape_cast %4 : vector<1x1x128xf32> to vector<1x128xf32>
    %6 = vector.broadcast %5 : vector<1x128xf32> to vector<128x128xf32>
    %7 = arith.addf %3, %6 : vector<128x128xf32>
    %cst_7 = arith.constant 0.000000e+00 : f32
    %8 = vector.broadcast %cst_7 : f32 to vector<128x128xf32>
    %9 = arith.cmpf ogt, %7, %8 : vector<128x128xf32>
    %cst_8 = arith.constant 2.000000e-01 : f32
    %10 = vector.broadcast %cst_8 : f32 to vector<128x128xf32>
    %11 = arith.mulf %10, %7 : vector<128x128xf32>
    %12 = arith.select %9, %7, %11 : vector<128x128xi1>, vector<128x128xf32>
    %c1 = arith.constant 1 : index
    %c0_9 = arith.constant 0 : index
    %c0_10 = arith.constant 0 : index
    %13 = vector.load %arg2[%c1, %c0_9, %c0_10] : memref<2x128x128xf32, #tpu.memory_space<vmem>>, vector<1x128x128xf32>
    %14 = vector.shape_cast %13 : vector<1x128x128xf32> to vector<128x128xf32>
    %cst_11 = arith.constant dense<0.000000e+00> : vector<128x128xf32>
    %15 = tpu.matmul %12, %14, %cst_11 {dimension_numbers = #tpu.dot_dimension_numbers<[1], [0], [0], [1], [0, 0, 1, 1], [], []>} : vector<128x128xf32>, vector<128x128xf32>, vector<128x128xf32> -> vector<128x128xf32>
    %c1_12 = arith.constant 1 : index
    %c0_13 = arith.constant 0 : index
    %c0_14 = arith.constant 0 : index
    %16 = vector.load %arg3[%c1_12, %c0_13, %c0_14] : memref<2x1x128xf32, #tpu.memory_space<vmem>>, vector<1x1x128xf32>
    %17 = vector.shape_cast %16 : vector<1x1x128xf32> to vector<1x128xf32>
    %18 = vector.broadcast %17 : vector<1x128xf32> to vector<128x128xf32>
    %19 = arith.addf %15, %18 : vector<128x128xf32>
    %cst_15 = arith.constant 0.000000e+00 : f32
    %20 = vector.broadcast %cst_15 : f32 to vector<128x128xf32>
    %21 = arith.cmpf ogt, %19, %20 : vector<128x128xf32>
    %cst_16 = arith.constant 2.000000e-01 : f32
    %22 = vector.broadcast %cst_16 : f32 to vector<128x128xf32>
    %23 = arith.mulf %22, %19 : vector<128x128xf32>
    %24 = arith.select %21, %19, %23 : vector<128x128xi1>, vector<128x128xf32>
    %25 = tpu.transpose %24, [1, 0] : vector<128x128xf32> -> vector<128x128xf32>
    %c0_17 = arith.constant 0 : index
    %26 = memref.load %arg0[%c0_17] : memref<3xf32, #tpu.memory_space<smem>>
    %27 = vector.broadcast %26 : f32 to vector<128x128xf32>
    %28 = arith.mulf %25, %27 : vector<128x128xf32>
    %c0_18 = arith.constant 0 : index
    %c0_19 = arith.constant 0 : index
    %29 = vector.load %arg4[%c0_18, %c0_19] : memref<128x128xf32, #tpu.memory_space<vmem>>, vector<128x128xf32>
    tpu.vector_store %arg4[%c0_18, %c0_19], %28 {strides = array<i32>} : memref<128x128xf32, #tpu.memory_space<vmem>>, vector<128x128xf32>,
    return
  }
}

</mosaic_0001>

<bundles_post_ra>
// kernel: tpu_custom_call.1
= control target key start
LH: loop header
LB: loop body
LE: loop exit
PB: predicated region body
PF: predicated region fallthrough
CT: control target
= control target key end

     0   :  { %9 = vsyncpa [#allocation5], 0  ;;  %s1055_s0 = inlined_call_operand.hbm [shape: f32[3], index: 0, kind: input, shape index: {}]   ;;  %s1056_s1 = inlined_call_operand.hbm [shape: f32[128,128], index: 1, kind: input, shape index: {}]   ;;  %s1057_s2 = inlined_call_operand.hbm [shape: f32[2,128,128], index: 2, kind: input, shape index: {}]   ;;  %s1058_s3 = inlined_call_operand.vmem [shape: f32[2,1,128], index: 3, kind: input, shape index: {}]   ;;  %s1059_s4 = inlined_call_operand.hbm [shape: f32[128,128], index: 4, kind: output, shape index: {}]  }
   0x1   :  { %10 = vsyncpa [#allocation3], 0 }
   0x2   :  { %11 = vsyncpa [#allocation8], 0 }
   0x3   :  { %12 = vsyncpa [#allocation4], 0  ;;  %s841_s17 = scalar_lea.hbm %s1055_s0, 16 }
   0x4   :  { %p842_p0 = scmp.ne.s32.totalorder %s1055_s0, %s841_s17  ;;  %p845_p1 = scmp.lt.u32.totalorder %s841_s17, %s1055_s0 }
   0x6   :  { %p847_p2 = pnand %p845_p1, %p842_p0 }
   0x8   :  { %850 = shalt.err (!%p847_p2)
}
   0x9   :  { %s925_s22 = smov [#allocation2]   ;;  %s926_s25 = smov [#allocation6]  }
   0xa   :  { %20 = dma.hbm_to_smem %s1055_s0, 16, %s925_s22, [#allocation5]  }
   0xb   :  { %s26_s26 = sshll.u32 %s926_s25, 4  ;;  %s851_s29 = scalar_lea.hbm %s1056_s1, 2048  ;;  %s27_s26 = int_to_ptr.vmem [resolvable:$true] %s26_s26 }
   0xc   :  { %p852_p3 = scmp.ne.s32.totalorder %s1056_s1, %s851_s29  ;;  %p855_p4 = scmp.lt.u32.totalorder %s851_s29, %s1056_s1 }
   0xe   :  { %p857_p5 = pnand %p855_p4, %p852_p3 }
  0x10   :  { %860 = shalt.err (!%p857_p5)
}
  0x11   :  { %s861_s8 = scalar_lea.vmem %s27_s26, 2048  ;;  %p866_p7 = scmp.lt.s32.totalorder %s27_s26, %s27_s26 }
  0x12   :  { %p862_p6 = scmp.ne.s32.totalorder %s27_s26, %s861_s8  ;;  %p867_p8 = scmp.lt.s32.totalorder %s861_s8, %s861_s8 }
  0x14   :  { %p868_p9 = por %p867_p8, %p866_p7 }
  0x16   :  { %p869_p10 = pnand %p868_p9, %p862_p6 }
  0x18   :  { %872 = shalt.err (!%p869_p10)
}
  0x19   :  { %s927_s0 = smov 128   ;;  %s928_s9 = smov 8  }
  0x1a   :  { %32 = dma.hbm_to_vmem [thread:$0]  %s1056_s1, 2048, %s27_s26, [#allocation3], %s927_s0, %s927_s0, %s928_s9  }
  0x1b   :  { %s929_s12 = smov [#allocation7]   ;;  %s873_s16 = scalar_lea.hbm %s1057_s2, 4096 }
  0x1c   :  { %s38_s13 = sshll.u32 %s929_s12, 4  ;;  %p874_p11 = scmp.ne.s32.totalorder %s1057_s2, %s873_s16  ;;  %s39_s13 = int_to_ptr.vmem [resolvable:$true] %s38_s13 }
  0x1d   :  { %p877_p12 = scmp.lt.u32.totalorder %s873_s16, %s1057_s2 }
  0x1f   :  { %p879_p13 = pnand %p877_p12, %p874_p11 }
  0x21   :  { %882 = shalt.err (!%p879_p13)
}
  0x22   :  { %s883_s21 = scalar_lea.vmem %s39_s13, 4096  ;;  %p888_p1 = scmp.lt.s32.totalorder %s39_s13, %s39_s13 }
  0x23   :  { %p884_p0 = scmp.ne.s32.totalorder %s39_s13, %s883_s21  ;;  %p889_p2 = scmp.lt.s32.totalorder %s883_s21, %s883_s21 }
  0x25   :  { %p890_p3 = por %p889_p2, %p888_p1 }
  0x27   :  { %p891_p4 = pnand %p890_p3, %p884_p0 }
  0x29   :  { %894 = shalt.err (!%p891_p4)
}
  0x2a   :  { %44 = dma.hbm_to_vmem [thread:$0]  %s1057_s2, 4096, %s39_s13, [#allocation8], %s927_s0, %s927_s0, %s928_s9  }
  0x2b   :  { %917 = dma.done.wait [#allocation5], 16  }
  0x2c   :  { %918 = vsyncadd [#allocation5], 4294967280 }
  0x2d   :  { %919 = dma.done.wait [#allocation3], 2048  }
  0x2e   :  { %920 = vsyncadd [#allocation3], 4294965248 }
  0x2f   :  { %921 = dma.done.wait [#allocation8], 4096  }
  0x30   :  { %922 = vsyncadd [#allocation8], 4294963200 }
  0x31   :  { %56 = sfence }
  0x32   :  { %v73_v0 = vld [vmem:[#allocation7] sm:$0xff]  ;;  %v74_v1 = vld [vmem:[#allocation7 + $0x8] sm:$0xff]  ;;  %v75_v2 = vld [vmem:[#allocation7 + $0x10] sm:$0xff]  ;;  %s930_s26 = smov [#allocation9]  }
  0x33   :  { %v771_v3 = vpack.c.bf16 %v74_v1, %v73_v0  ;;  %v76_v4 = vld [vmem:[#allocation7 + $0x18] sm:$0xff]  ;;  %v77_v6 = vld [vmem:[#allocation7 + $0x20] sm:$0xff]  ;;  %v78_v7 = vld [vmem:[#allocation7 + $0x28] sm:$0xff]  ;;  %s578_s27 = sshll.u32 %s930_s26, 4  ;;  %s579_s27 = int_to_ptr.vmem [resolvable:$true] %s578_s27 }
  0x34   :  { %v775_v5 = vpack.c.bf16 %v76_v4, %v75_v2  ;;  %v779_v8 = vpack.c.bf16 %v78_v7, %v77_v6  ;;  %v57_v9 = vld [vmem:[#allocation6] sm:$0xff]  ;;  %v79_v10 = vld [vmem:[#allocation7 + $0x30] sm:$0xff]  ;;  %v80_v11 = vld [vmem:[#allocation7 + $0x38] sm:$0xff]  ;;  %s895_s28 = scalar_lea.vmem %s579_s27, 2048  ;;  %p900_p6 = scmp.lt.s32.totalorder %s579_s27, %s579_s27 }
  0x35   :  { %772 = vmatprep.subr.bf16.mxu0 %v771_v3  ;;  %691 = vmatprep.mubr.f32.mxu0 %v57_v9  ;;  %v783_v12 = vpack.c.bf16 %v80_v11, %v79_v10  ;;  %v81_v13 = vld [vmem:[#allocation7 + $0x40] sm:$0xff]  ;;  %v82_v14 = vld [vmem:[#allocation7 + $0x48] sm:$0xff]  ;;  %v292_v17 = vld [vmem:[#allocation7 + $0x90] sm:$0xff]  ;;  %p896_p5 = scmp.ne.s32.totalorder %s579_s27, %s895_s28  ;;  %p901_p7 = scmp.lt.s32.totalorder %s895_s28, %s895_s28 }
  0x36   :  { %774 = vmatpush3.bf16.msra.mxu0 %v771_v3  ;;  %v290_v15 = vld [vmem:[#allocation7 + $0x80] sm:$0xff]  ;;  %v291_v16 = vld [vmem:[#allocation7 + $0x88] sm:$0xff]  ;;  %v293_v18 = vld [vmem:[#allocation7 + $0x98] sm:$0xff]  ;;  %v787_v21 = vpack.c.bf16 %v82_v14, %v81_v13 }
  0x37   :  { %776 = vmatprep.subr.bf16.mxu0 %v775_v5  ;;  %v803_v19 = vpack.c.bf16 %v291_v16, %v290_v15  ;;  %v807_v20 = vpack.c.bf16 %v293_v18, %v292_v17  ;;  %v294_v22 = vld [vmem:[#allocation7 + $0xa0] sm:$0xff]  ;;  %v295_v23 = vld [vmem:[#allocation7 + $0xa8] sm:$0xff]  ;;  %v83_v24 = vld [vmem:[#allocation7 + $0x50] sm:$0xff]  ;;  %p902_p8 = por %p901_p7, %p900_p6 }
  0x38   :  { %v84_v25 = vld [vmem:[#allocation7 + $0x58] sm:$0xff]  ;;  %v811_v26 = vpack.c.bf16 %v295_v23, %v294_v22  ;;  %v296_v28 = vld [vmem:[#allocation7 + $0xb0] sm:$0xff]  ;;  %v85_v30 = vld [vmem:[#allocation7 + $0x60] sm:$0xff] }
  0x39   :  { %804 = vmatprep.subr.bf16.mxu1 %v803_v19  ;;  %v791_v27 = vpack.c.bf16 %v84_v25, %v83_v24  ;;  %v297_v29 = vld [vmem:[#allocation7 + $0xb8] sm:$0xff]  ;;  %v86_v31 = vld [vmem:[#allocation7 + $0x68] sm:$0xff]  ;;  %v298_v34 = vld [vmem:[#allocation7 + $0xc0] sm:$0xff]  ;;  %p903_p9 = pnand %p902_p8, %p896_p5 }
  0x3a   :  { %778 = vmatpush3.bf16.msra.mxu0 %v775_v5  ;;  %806 = vmatpush3.bf16.msra.mxu1 %v803_v19  ;;  %v815_v32 = vpack.c.bf16 %v297_v29, %v296_v28  ;;  %v795_v33 = vpack.c.bf16 %v86_v31, %v85_v30  ;;  %v299_v35 = vld [vmem:[#allocation7 + $0xc8] sm:$0xff]  ;;  %v87_v36 = vld [vmem:[#allocation7 + $0x70] sm:$0xff]  ;;  %v88_v37 = vld [vmem:[#allocation7 + $0x78] sm:$0xff] }
  0x3b   :  { %780 = vmatprep.subr.bf16.mxu0 %v779_v8  ;;  %808 = vmatprep.subr.bf16.mxu1 %v807_v20  ;;  %v819_v38 = vpack.c.bf16 %v299_v35, %v298_v34  ;;  %v799_v39 = vpack.c.bf16 %v88_v37, %v87_v36  ;;  %v300_v40 = vld [vmem:[#allocation7 + $0xd0] sm:$0xff]  ;;  %v301_v41 = vld [vmem:[#allocation7 + $0xd8] sm:$0xff]  ;;  %v58_v43 = vld [vmem:[#allocation6 + $0x8] sm:$0xff] }
  0x3c   :  { %v823_v42 = vpack.c.bf16 %v301_v41, %v300_v40  ;;  %v59_v44 = vld [vmem:[#allocation6 + $0x10] sm:$0xff]  ;;  %v60_v45 = vld [vmem:[#allocation6 + $0x18] sm:$0xff]  ;;  %v61_v46 = vld [vmem:[#allocation6 + $0x20] sm:$0xff] }
  0x3d   :  { %v62_v47 = vld [vmem:[#allocation6 + $0x28] sm:$0xff]  ;;  %v63_v48 = vld [vmem:[#allocation6 + $0x30] sm:$0xff]  ;;  %v64_v49 = vld [vmem:[#allocation6 + $0x38] sm:$0xff] }
  0x3e   :  { %782 = vmatpush3.bf16.msra.mxu0 %v779_v8  ;;  %810 = vmatpush3.bf16.msra.mxu1 %v807_v20  ;;  %v65_v50 = vld [vmem:[#allocation6 + $0x40] sm:$0xff]  ;;  %v66_v51 = vld [vmem:[#allocation6 + $0x48] sm:$0xff]  ;;  %v67_v52 = vld [vmem:[#allocation6 + $0x50] sm:$0xff] }
  0x3f   :  { %784 = vmatprep.subr.bf16.mxu0 %v783_v12  ;;  %812 = vmatprep.subr.bf16.mxu1 %v811_v26  ;;  %v68_v53 = vld [vmem:[#allocation6 + $0x58] sm:$0xff]  ;;  %v69_v54 = vld [vmem:[#allocation6 + $0x60] sm:$0xff]  ;;  %v70_v55 = vld [vmem:[#allocation6 + $0x68] sm:$0xff] }
  0x40   :  { %v71_v56 = vld [vmem:[#allocation6 + $0x70] sm:$0xff]  ;;  %v72_v57 = vld [vmem:[#allocation6 + $0x78] sm:$0xff]  ;;  %v302_v58 = vld [vmem:[#allocation7 + $0xe0] sm:$0xff] }
  0x41   :  { %v303_v59 = vld [vmem:[#allocation7 + $0xe8] sm:$0xff]  ;;  %v304_v61 = vld [vmem:[#allocation7 + $0xf0] sm:$0xff]  ;;  %v305_v62 = vld [vmem:[#allocation7 + $0xf8] sm:$0xff] }
  0x42   :  { %786 = vmatpush3.bf16.msra.mxu0 %v783_v12  ;;  %814 = vmatpush3.bf16.msra.mxu1 %v811_v26  ;;  %v827_v60 = vpack.c.bf16 %v303_v59, %v302_v58  ;;  %v831_v63 = vpack.c.bf16 %v305_v62, %v304_v61  ;;  %v1001_v0 = vld [vmem:[%s1058_s3] ss:$0 sm:$0xff] }
  0x43   :  { %788 = vmatprep.subr.bf16.mxu0 %v787_v21  ;;  %816 = vmatprep.subr.bf16.mxu1 %v815_v32 }
  0x46   :  { %790 = vmatpush3.bf16.msra.mxu0 %v787_v21  ;;  %818 = vmatpush3.bf16.msra.mxu1 %v815_v32 }
  0x47   :  { %792 = vmatprep.subr.bf16.mxu0 %v791_v27  ;;  %820 = vmatprep.subr.bf16.mxu1 %v819_v38 }
  0x4a   :  { %794 = vmatpush3.bf16.msra.mxu0 %v791_v27  ;;  %822 = vmatpush3.bf16.msra.mxu1 %v819_v38 }
  0x4b   :  { %796 = vmatprep.subr.bf16.mxu0 %v795_v33  ;;  %824 = vmatprep.subr.bf16.mxu1 %v823_v42 }
  0x4e   :  { %798 = vmatpush3.bf16.msra.mxu0 %v795_v33  ;;  %826 = vmatpush3.bf16.msra.mxu1 %v823_v42 }
  0x4f   :  { %800 = vmatprep.subr.bf16.mxu0 %v799_v39  ;;  %828 = vmatprep.subr.bf16.mxu1 %v827_v60 }
  0x52   :  { %802 = vmatpush3.bf16.msra.mxu0 %v799_v39  ;;  %830 = vmatpush3.bf16.msra.mxu1 %v827_v60 }
  0x53   :  { %832 = vmatprep.subr.bf16.mxu1 %v831_v63 }
  0x55   :  { %692 = vmatmul.mubr.f32.vlgmr.msra.gmra.mrb[0].mxu0 %v58_v43 }
  0x56   :  { %694 = vmatprep.mubr.f32.mxu0 %v59_v44  ;;  %834 = vmatpush3.bf16.msra.mxu1 %v831_v63 }
  0x59   :  { %695 = vmatmul.mubr.f32.gmra.mrb[2].mxu0 %v60_v45 }
  0x5a   :  { %697 = vmatprep.mubr.f32.mxu0 %v61_v46 }
  0x5d   :  { %698 = vmatmul.mubr.f32.gmra.mrb[4].mxu0 %v62_v47 }
  0x5e   :  { %700 = vmatprep.mubr.f32.mxu0 %v63_v48 }
  0x61   :  { %701 = vmatmul.mubr.f32.gmra.mrb[6].mxu0 %v64_v49 }
  0x62   :  { %703 = vmatprep.mubr.f32.mxu0 %v65_v50 }
  0x65   :  { %704 = vmatmul.mubr.f32.gmra.mrb[8].mxu0 %v66_v51 }
  0x66   :  { %706 = vmatprep.mubr.f32.mxu0 %v67_v52 }
  0x69   :  { %707 = vmatmul.mubr.f32.gmra.mrb[10].mxu0 %v68_v53 }
  0x6a   :  { %709 = vmatprep.mubr.f32.mxu0 %v69_v54 }
  0x6d   :  { %710 = vmatmul.mubr.f32.gmra.mrb[12].mxu0 %v70_v55 }
  0x6e   :  { %712 = vmatprep.mubr.f32.mxu0 %v71_v56 }
  0x71   :  { %713 = vmatmul.mubr.f32.gmra.mrb[14].mxu0 %v72_v57 }
 0x128   :  { %v693_v1 = vpop.f32.mrb[0].mxu0 }
 0x129   :  { %v168_v2 = vadd.f32 %v693_v1, %v1001_v0  ;;  %v162_v3 = vpop.f32.mrb[1].mxu0 }
 0x12a   :  { %v163_v4 = vadd.f32 %v1001_v0, %v162_v3 }
 0x12b   :  { %v258_v5 = vmul.f32 0.2, %v168_v2  ;;  %vm242_vm1 = vcmp.gt.f32.partialorder %v168_v2, 0.0 }
 0x12c   :  { %v696_v6 = vpop.f32.mrb[2].mxu0  ;;  %vm241_vm0 = vcmp.gt.f32.partialorder %v163_v4, 0.0  ;;  %v257_v7 = vmul.f32 0.2, %v163_v4 }
 0x12d   :  { %v178_v8 = vadd.f32 %v696_v6, %v1001_v0  ;;  %v172_v9 = vpop.f32.mrb[3].mxu0  ;;  %v274_v13 = vsel %vm242_vm1, %v168_v2, %v258_v5  ;;  %v1022_v2 = vld [vmem:[%s1058_s3 + $0x1] ss:$0 sm:$0xff]  ;;  %s539_s3 = sld [smem:[#allocation2]] }
 0x12e   :  { %v173_v10 = vadd.f32 %v1001_v0, %v172_v9  ;;  %v273_v11 = vsel %vm241_vm0, %v163_v4, %v257_v7 }
 0x12f   :  { %v260_v12 = vmul.f32 0.2, %v178_v8  ;;  %747 = vmatprep.mubr.f32.mxu1 %v273_v11  ;;  %vm244_vm2 = vcmp.gt.f32.partialorder %v178_v8, 0.0 }
 0x130   :  { %v259_v14 = vmul.f32 0.2, %v173_v10  ;;  %748 = vmatmul.mubr.f32.vlgmr.msra.gmra.mrb[0].mxu1 %v274_v13  ;;  %v699_v15 = vpop.f32.mrb[4].mxu0  ;;  %vm243_vm3 = vcmp.gt.f32.partialorder %v173_v10, 0.0 }
 0x131   :  { %v188_v16 = vadd.f32 %v699_v15, %v1001_v0  ;;  %v182_v17 = vpop.f32.mrb[5].mxu0  ;;  %v276_v18 = vsel %vm244_vm2, %v178_v8, %v260_v12 }
 0x132   :  { %v183_v19 = vadd.f32 %v1001_v0, %v182_v17  ;;  %v275_v20 = vsel %vm243_vm3, %v173_v10, %v259_v14 }
 0x133   :  { %v262_v21 = vmul.f32 0.2, %v188_v16  ;;  %750 = vmatprep.mubr.f32.mxu1 %v275_v20  ;;  %vm246_vm4 = vcmp.gt.f32.partialorder %v188_v16, 0.0 }
 0x134   :  { %v261_v22 = vmul.f32 0.2, %v183_v19  ;;  %751 = vmatmul.mubr.f32.gmra.mrb[2].mxu1 %v276_v18  ;;  %vm245_vm5 = vcmp.gt.f32.partialorder %v183_v19, 0.0  ;;  %v702_v23 = vpop.f32.mrb[6].mxu0 }
 0x135   :  { %v198_v24 = vadd.f32 %v702_v23, %v1001_v0  ;;  %v278_v25 = vsel %vm246_vm4, %v188_v16, %v262_v21  ;;  %v192_v26 = vpop.f32.mrb[7].mxu0 }
 0x136   :  { %v277_v27 = vsel %vm245_vm5, %v183_v19, %v261_v22  ;;  %v193_v28 = vadd.f32 %v1001_v0, %v192_v26 }
 0x137   :  { %753 = vmatprep.mubr.f32.mxu1 %v277_v27  ;;  %v264_v29 = vmul.f32 0.2, %v198_v24  ;;  %vm248_vm6 = vcmp.gt.f32.partialorder %v198_v24, 0.0 }
 0x138   :  { %754 = vmatmul.mubr.f32.gmra.mrb[4].mxu1 %v278_v25  ;;  %v263_v30 = vmul.f32 0.2, %v193_v28  ;;  %vm247_vm7 = vcmp.gt.f32.partialorder %v193_v28, 0.0  ;;  %v705_v31 = vpop.f32.mrb[8].mxu0 }
 0x139   :  { %v208_v32 = vadd.f32 %v705_v31, %v1001_v0  ;;  %v280_v33 = vsel %vm248_vm6, %v198_v24, %v264_v29  ;;  %v202_v34 = vpop.f32.mrb[9].mxu0 }
 0x13a   :  { %v279_v35 = vsel %vm247_vm7, %v193_v28, %v263_v30  ;;  %v203_v36 = vadd.f32 %v1001_v0, %v202_v34 }
 0x13b   :  { %756 = vmatprep.mubr.f32.mxu1 %v279_v35  ;;  %v266_v37 = vmul.f32 0.2, %v208_v32  ;;  %vm250_vm8 = vcmp.gt.f32.partialorder %v208_v32, 0.0 }
 0x13c   :  { %757 = vmatmul.mubr.f32.gmra.mrb[6].mxu1 %v280_v33  ;;  %v265_v38 = vmul.f32 0.2, %v203_v36  ;;  %vm249_vm9 = vcmp.gt.f32.partialorder %v203_v36, 0.0  ;;  %v708_v39 = vpop.f32.mrb[10].mxu0 }
 0x13d   :  { %v218_v40 = vadd.f32 %v708_v39, %v1001_v0  ;;  %v282_v41 = vsel %vm250_vm8, %v208_v32, %v266_v37  ;;  %v212_v42 = vpop.f32.mrb[11].mxu0 }
 0x13e   :  { %v281_v43 = vsel %vm249_vm9, %v203_v36, %v265_v38  ;;  %v213_v44 = vadd.f32 %v1001_v0, %v212_v42 }
 0x13f   :  { %759 = vmatprep.mubr.f32.mxu1 %v281_v43  ;;  %v268_v45 = vmul.f32 0.2, %v218_v40  ;;  %vm252_vm10 = vcmp.gt.f32.partialorder %v218_v40, 0.0 }
 0x140   :  { %760 = vmatmul.mubr.f32.gmra.mrb[8].mxu1 %v282_v41  ;;  %v267_v46 = vmul.f32 0.2, %v213_v44  ;;  %vm251_vm11 = vcmp.gt.f32.partialorder %v213_v44, 0.0  ;;  %v711_v47 = vpop.f32.mrb[12].mxu0 }
 0x141   :  { %v228_v48 = vadd.f32 %v711_v47, %v1001_v0  ;;  %v284_v49 = vsel %vm252_vm10, %v218_v40, %v268_v45  ;;  %v222_v50 = vpop.f32.mrb[13].mxu0 }
 0x142   :  { %v283_v51 = vsel %vm251_vm11, %v213_v44, %v267_v46  ;;  %v223_v52 = vadd.f32 %v1001_v0, %v222_v50 }
 0x143   :  { %762 = vmatprep.mubr.f32.mxu1 %v283_v51  ;;  %v270_v53 = vmul.f32 0.2, %v228_v48  ;;  %vm254_vm12 = vcmp.gt.f32.partialorder %v228_v48, 0.0 }
 0x144   :  { %763 = vmatmul.mubr.f32.gmra.mrb[10].mxu1 %v284_v49  ;;  %v269_v54 = vmul.f32 0.2, %v223_v52  ;;  %vm253_vm13 = vcmp.gt.f32.partialorder %v223_v52, 0.0  ;;  %v714_v55 = vpop.f32.mrb[14].mxu0 }
 0x145   :  { %v238_v56 = vadd.f32 %v714_v55, %v1001_v0  ;;  %v286_v57 = vsel %vm254_vm12, %v228_v48, %v270_v53  ;;  %v232_v58 = vpop.f32.mrb[15].mxu0 }
 0x146   :  { %v285_v59 = vsel %vm253_vm13, %v223_v52, %v269_v54  ;;  %v233_v60 = vadd.f32 %v1001_v0, %v232_v58 }
 0x147   :  { %765 = vmatprep.mubr.f32.mxu1 %v285_v59  ;;  %v272_v61 = vmul.f32 0.2, %v238_v56  ;;  %vm256_vm14 = vcmp.gt.f32.partialorder %v238_v56, 0.0 }
 0x148   :  { %766 = vmatmul.mubr.f32.gmra.mrb[12].mxu1 %v286_v57  ;;  %v271_v62 = vmul.f32 0.2, %v233_v60  ;;  %vm255_vm15 = vcmp.gt.f32.partialorder %v233_v60, 0.0 }
 0x149   :  { %v288_v63 = vsel %vm256_vm14, %v238_v56, %v272_v61 }
 0x14a   :  { %v287_v1 = vsel %vm255_vm15, %v233_v60, %v271_v62 }
 0x14b   :  { %768 = vmatprep.mubr.f32.mxu1 %v287_v1 }
 0x14c   :  { %769 = vmatmul.mubr.f32.gmra.mrb[14].mxu1 %v288_v63 }
 0x203   :  { %v749_v3 = vpop.f32.mrb[0].mxu1 }
 0x204   :  { %v380_v4 = vpop.f32.mrb[1].mxu1  ;;  %v386_v5 = vadd.f32 %v749_v3, %v1022_v2 }
 0x205   :  { %v381_v0 = vadd.f32 %v1022_v2, %v380_v4  ;;  %v540_v4 = vstv %s539_s3 }
 0x206   :  { %v476_v11 = vmul.f32 0.2, %v386_v5  ;;  %vm460_vm1 = vcmp.gt.f32.partialorder %v386_v5, 0.0 }
 0x207   :  { %v752_v6 = vpop.f32.mrb[2].mxu1  ;;  %vm459_vm0 = vcmp.gt.f32.partialorder %v381_v0, 0.0  ;;  %v475_v7 = vmul.f32 0.2, %v381_v0 }
 0x208   :  { %v390_v8 = vpop.f32.mrb[3].mxu1  ;;  %v396_v14 = vadd.f32 %v752_v6, %v1022_v2  ;;  %v492_v15 = vsel %vm460_vm1, %v386_v5, %v476_v11 }
 0x209   :  { %v391_v9 = vadd.f32 %v1022_v2, %v390_v8  ;;  %v491_v10 = vsel %vm459_vm0, %v381_v0, %v475_v7 }
 0x20a   :  { %507 = vxpose.xlu0.b32.start [1/16] %v491_v10, 128  ;;  %v478_v21 = vmul.f32 0.2, %v396_v14  ;;  %vm462_vm3 = vcmp.gt.f32.partialorder %v396_v14, 0.0 }
 0x20b   :  { %v755_v12 = vpop.f32.mrb[4].mxu1  ;;  %v477_v16 = vmul.f32 0.2, %v391_v9  ;;  %vm461_vm2 = vcmp.gt.f32.partialorder %v391_v9, 0.0 }
 0x20c   :  { %v400_v13 = vpop.f32.mrb[5].mxu1  ;;  %v406_v24 = vadd.f32 %v755_v12, %v1022_v2  ;;  %v494_v25 = vsel %vm462_vm3, %v396_v14, %v478_v21 }
 0x20d   :  { %v401_v19 = vadd.f32 %v1022_v2, %v400_v13  ;;  %v493_v20 = vsel %vm461_vm2, %v391_v9, %v477_v16 }
 0x20e   :  { %508 = vxpose.xlu0.b32.cont [2/16] %v492_v15, 128  ;;  %v480_v31 = vmul.f32 0.2, %v406_v24  ;;  %vm464_vm5 = vcmp.gt.f32.partialorder %v406_v24, 0.0 }
 0x20f   :  { %v758_v17 = vpop.f32.mrb[6].mxu1  ;;  %v479_v26 = vmul.f32 0.2, %v401_v19  ;;  %vm463_vm4 = vcmp.gt.f32.partialorder %v401_v19, 0.0 }
 0x210   :  { %v410_v18 = vpop.f32.mrb[7].mxu1  ;;  %v416_v34 = vadd.f32 %v758_v17, %v1022_v2  ;;  %v496_v35 = vsel %vm464_vm5, %v406_v24, %v480_v31 }
 0x211   :  { %v411_v29 = vadd.f32 %v1022_v2, %v410_v18  ;;  %v495_v30 = vsel %vm463_vm4, %v401_v19, %v479_v26 }
 0x212   :  { %509 = vxpose.xlu0.b32.cont [3/16] %v493_v20, 128  ;;  %v482_v41 = vmul.f32 0.2, %v416_v34  ;;  %vm466_vm7 = vcmp.gt.f32.partialorder %v416_v34, 0.0 }
 0x213   :  { %v761_v22 = vpop.f32.mrb[8].mxu1  ;;  %v481_v36 = vmul.f32 0.2, %v411_v29  ;;  %vm465_vm6 = vcmp.gt.f32.partialorder %v411_v29, 0.0 }
 0x214   :  { %v420_v23 = vpop.f32.mrb[9].mxu1  ;;  %v426_v42 = vadd.f32 %v761_v22, %v1022_v2  ;;  %v498_v43 = vsel %vm466_vm7, %v416_v34, %v482_v41 }
 0x215   :  { %v421_v39 = vadd.f32 %v1022_v2, %v420_v23  ;;  %v497_v40 = vsel %vm465_vm6, %v411_v29, %v481_v36 }
 0x216   :  { %510 = vxpose.xlu0.b32.cont [4/16] %v494_v25, 128  ;;  %v484_v47 = vmul.f32 0.2, %v426_v42  ;;  %vm468_vm9 = vcmp.gt.f32.partialorder %v426_v42, 0.0 }
 0x217   :  { %v764_v27 = vpop.f32.mrb[10].mxu1  ;;  %v483_v44 = vmul.f32 0.2, %v421_v39  ;;  %vm467_vm8 = vcmp.gt.f32.partialorder %v421_v39, 0.0 }
 0x218   :  { %v430_v28 = vpop.f32.mrb[11].mxu1  ;;  %v436_v48 = vadd.f32 %v764_v27, %v1022_v2  ;;  %v500_v49 = vsel %vm468_vm9, %v426_v42, %v484_v47 }
 0x219   :  { %v431_v45 = vadd.f32 %v1022_v2, %v430_v28  ;;  %v499_v46 = vsel %vm467_vm8, %v421_v39, %v483_v44 }
 0x21a   :  { %511 = vxpose.xlu0.b32.cont [5/16] %v495_v30, 128  ;;  %v486_v53 = vmul.f32 0.2, %v436_v48  ;;  %vm470_vm11 = vcmp.gt.f32.partialorder %v436_v48, 0.0 }
 0x21b   :  { %v767_v32 = vpop.f32.mrb[12].mxu1  ;;  %v485_v50 = vmul.f32 0.2, %v431_v45  ;;  %vm469_vm10 = vcmp.gt.f32.partialorder %v431_v45, 0.0 }
 0x21c   :  { %v440_v33 = vpop.f32.mrb[13].mxu1  ;;  %v446_v54 = vadd.f32 %v767_v32, %v1022_v2  ;;  %v502_v55 = vsel %vm470_vm11, %v436_v48, %v486_v53 }
 0x21d   :  { %v441_v51 = vadd.f32 %v1022_v2, %v440_v33  ;;  %v501_v52 = vsel %vm469_vm10, %v431_v45, %v485_v50 }
 0x21e   :  { %512 = vxpose.xlu0.b32.cont [6/16] %v496_v35, 128  ;;  %v488_v59 = vmul.f32 0.2, %v446_v54  ;;  %vm472_vm13 = vcmp.gt.f32.partialorder %v446_v54, 0.0 }
 0x21f   :  { %v770_v37 = vpop.f32.mrb[14].mxu1  ;;  %v487_v56 = vmul.f32 0.2, %v441_v51  ;;  %vm471_vm12 = vcmp.gt.f32.partialorder %v441_v51, 0.0 }
 0x220   :  { %v450_v38 = vpop.f32.mrb[15].mxu1  ;;  %v456_v60 = vadd.f32 %v770_v37, %v1022_v2  ;;  %v504_v61 = vsel %vm472_vm13, %v446_v54, %v488_v59 }
 0x221   :  { %v451_v57 = vadd.f32 %v1022_v2, %v450_v38  ;;  %v503_v58 = vsel %vm471_vm12, %v441_v51, %v487_v56 }
 0x222   :  { %513 = vxpose.xlu0.b32.cont [7/16] %v497_v40, 128  ;;  %v490_v1 = vmul.f32 0.2, %v456_v60  ;;  %vm474_vm15 = vcmp.gt.f32.partialorder %v456_v60, 0.0 }
 0x223   :  { %v489_v62 = vmul.f32 0.2, %v451_v57  ;;  %vm473_vm14 = vcmp.gt.f32.partialorder %v451_v57, 0.0 }
 0x224   :  { %v506_v3 = vsel %vm474_vm15, %v456_v60, %v490_v1 }
 0x225   :  { %v505_v63 = vsel %vm473_vm14, %v451_v57, %v489_v62 }
 0x226   :  { %514 = vxpose.xlu0.b32.cont [8/16] %v498_v43, 128 }
 0x22a   :  { %515 = vxpose.xlu0.b32.cont [9/16] %v499_v46, 128 }
 0x22e   :  { %516 = vxpose.xlu0.b32.cont [10/16] %v500_v49, 128 }
 0x232   :  { %517 = vxpose.xlu0.b32.cont [11/16] %v501_v52, 128 }
 0x236   :  { %518 = vxpose.xlu0.b32.cont [12/16] %v502_v55, 128 }
 0x23a   :  { %519 = vxpose.xlu0.b32.cont [13/16] %v503_v58, 128 }
 0x23e   :  { %520 = vxpose.xlu0.b32.cont [14/16] %v504_v61, 128 }
 0x242   :  { %521 = vxpose.xlu0.b32.cont [15/16] %v505_v63, 128 }
 0x246   :  { %522 = vxpose.xlu0.b32.end [16/16] %v506_v3, 128 }
 0x28a   :  { %v523_v5 = vpop.trf.xlu0 }
 0x28b   :  { %v541_v0 = vmul.f32 %v540_v4, %v523_v5 }
 0x28d   :  { %557 = vst [vmem:[#allocation9] sm:$0xff] %v541_v0 }
 0x28e   :  { %v524_v6 = vpop.trf.xlu0 }
 0x28f   :  { %v542_v7 = vmul.f32 %v540_v4, %v524_v6 }
 0x291   :  { %558 = vst [vmem:[#allocation9 + $0x8] sm:$0xff] %v542_v7 }
 0x292   :  { %v525_v8 = vpop.trf.xlu0 }
 0x293   :  { %v543_v2 = vmul.f32 %v540_v4, %v525_v8 }
 0x295   :  { %559 = vst [vmem:[#allocation9 + $0x10] sm:$0xff] %v543_v2 }
 0x296   :  { %v526_v9 = vpop.trf.xlu0 }
 0x297   :  { %v544_v10 = vmul.f32 %v540_v4, %v526_v9 }
 0x299   :  { %560 = vst [vmem:[#allocation9 + $0x18] sm:$0xff] %v544_v10 }
 0x29a   :  { %v527_v11 = vpop.trf.xlu0 }
 0x29b   :  { %v545_v12 = vmul.f32 %v540_v4, %v527_v11 }
 0x29d   :  { %561 = vst [vmem:[#allocation9 + $0x20] sm:$0xff] %v545_v12 }
 0x29e   :  { %v528_v13 = vpop.trf.xlu0 }
 0x29f   :  { %v546_v14 = vmul.f32 %v540_v4, %v528_v13 }
 0x2a1   :  { %562 = vst [vmem:[#allocation9 + $0x28] sm:$0xff] %v546_v14 }
 0x2a2   :  { %v529_v15 = vpop.trf.xlu0 }
 0x2a3   :  { %v547_v16 = vmul.f32 %v540_v4, %v529_v15 }
 0x2a5   :  { %563 = vst [vmem:[#allocation9 + $0x30] sm:$0xff] %v547_v16 }
 0x2a6   :  { %v530_v17 = vpop.trf.xlu0 }
 0x2a7   :  { %v548_v18 = vmul.f32 %v540_v4, %v530_v17 }
 0x2a9   :  { %564 = vst [vmem:[#allocation9 + $0x38] sm:$0xff] %v548_v18 }
 0x2aa   :  { %v531_v19 = vpop.trf.xlu0 }
 0x2ab   :  { %v549_v20 = vmul.f32 %v540_v4, %v531_v19 }
 0x2ad   :  { %565 = vst [vmem:[#allocation9 + $0x40] sm:$0xff] %v549_v20 }
 0x2ae   :  { %v532_v21 = vpop.trf.xlu0 }
 0x2af   :  { %v550_v22 = vmul.f32 %v540_v4, %v532_v21 }
 0x2b1   :  { %566 = vst [vmem:[#allocation9 + $0x48] sm:$0xff] %v550_v22 }
 0x2b2   :  { %v533_v23 = vpop.trf.xlu0 }
 0x2b3   :  { %v551_v24 = vmul.f32 %v540_v4, %v533_v23 }
 0x2b5   :  { %567 = vst [vmem:[#allocation9 + $0x50] sm:$0xff] %v551_v24 }
 0x2b6   :  { %v534_v25 = vpop.trf.xlu0 }
 0x2b7   :  { %v552_v26 = vmul.f32 %v540_v4, %v534_v25 }
 0x2b9   :  { %568 = vst [vmem:[#allocation9 + $0x58] sm:$0xff] %v552_v26 }
 0x2ba   :  { %v535_v27 = vpop.trf.xlu0 }
 0x2bb   :  { %v553_v28 = vmul.f32 %v540_v4, %v535_v27 }
 0x2bd   :  { %569 = vst [vmem:[#allocation9 + $0x60] sm:$0xff] %v553_v28 }
 0x2be   :  { %v536_v29 = vpop.trf.xlu0 }
 0x2bf   :  { %v554_v30 = vmul.f32 %v540_v4, %v536_v29 }
 0x2c1   :  { %570 = vst [vmem:[#allocation9 + $0x68] sm:$0xff] %v554_v30 }
 0x2c2   :  { %v537_v31 = vpop.trf.xlu0 }
 0x2c3   :  { %v555_v32 = vmul.f32 %v540_v4, %v537_v31 }
 0x2c5   :  { %571 = vst [vmem:[#allocation9 + $0x70] sm:$0xff] %v555_v32 }
 0x2c6   :  { %v538_v33 = vpop.trf.xlu0 }
 0x2c7   :  { %v556_v34 = vmul.f32 %v540_v4, %v538_v33 }
 0x2c9   :  { %572 = vst [vmem:[#allocation9 + $0x78] sm:$0xff] %v556_v34 }
 0x2ca   :  { %906 = shalt.err (!%p903_p9)
}
 0x2cb   :  { %s907_s5 = scalar_lea.hbm %s1059_s4, 2048 }
 0x2cc   :  { %p908_p10 = scmp.ne.s32.totalorder %s1059_s4, %s907_s5  ;;  %p911_p11 = scmp.lt.u32.totalorder %s907_s5, %s1059_s4 }
 0x2ce   :  { %p913_p12 = pnand %p911_p11, %p908_p10 }
 0x2d0   :  { %916 = shalt.err (!%p913_p12)
}
 0x2d1   :  { %584 = dma.vmem_to_hbm [thread:$0]  %s579_s27, 2048, %s1059_s4, [#allocation4], %s927_s0, %s927_s0, %s928_s9  }
 0x2d2   :  { %923 = dma.done.wait [#allocation4], 2048  }
 0x2d3   :  { %924 = vsyncadd [#allocation4], 4294965248 }
 0x2d4   :  { %588 = vsyncpa [#allocation3], 1 }
 0x2d5   :  { %589 = vsyncpa [#allocation8], 1 }
 0x2d6   :  { %590 = vsyncpa [#allocation4], 1 }
 0x2d7   :  { %591 = vsyncpa [#allocation5], 1 }

</bundles_post_ra>
